<compile_context>
chip_gen: v7x
topology: tpu7x:2x2x1
jax: 0.10.0
libtpu: 0.0.40
codegen_flags: <defaults>
</compile_context>

<pallas_src>
import jax
import jax.numpy as jnp
from jax.experimental import pallas as pl
from jax.experimental.pallas import tpu as pltpu


def _value_head_kernel(x_ref,    # (N, K)   VMEM f32   flattened input (K = C*H*W)
                       w_ref,    # (K, F1)  VMEM bf16  fused conv+fc1 weight
                       b1_ref,   # (1, F1)  VMEM f32   fused bias
                       w2_ref,   # (1, F1)  VMEM f32   fc2 weight row
                       b2_ref,   # (1,)     SMEM f32   fc2 bias
                       o_ref):   # (N, 1)   VMEM f32   output
    # --- fused conv + fc1 on the MXU: (N, K) @ (K, F1) -> f32 (N, F1) ---
    x_bf = x_ref[...].astype(jnp.bfloat16)           # cast only at MXU boundary
    h = jnp.dot(x_bf, w_ref[...], preferred_element_type=jnp.float32)
    h = jnp.maximum(h + b1_ref[...], 0.0)            # bias + ReLU in f32 (VPU)

    # --- fc2 as lane-dense multiply + cross-lane reduce (XLU), tanh (EUP) ---
    z = jnp.sum(h * w2_ref[...], axis=-1, keepdims=True) + b2_ref[0]
    o_ref[...] = jnp.tanh(z)


def prepare_value_head_params(wc, bc, w1, b1, w2, b2):
    """Fold the 1x1 conv into fc1 and pack weights. Run ONCE (outside the hot path).

    wc: (1, C, 1, 1)  conv weight      bc: (1,)   conv bias
    w1: (F1, HW)      fc1 weight       b1: (F1,)  fc1 bias
    w2: (1, F1)       fc2 weight       b2: (1,)   fc2 bias
    """
    C = wc.shape[1]
    F1, HW = w1.shape
    wc_flat = wc.reshape(C).astype(jnp.float32)
    # W_fused[c*HW + hw, f] = wc[c] * w1[f, hw]   (matches x.reshape(N, C*HW) order)
    w_fused = (wc_flat[:, None, None] * jnp.transpose(w1)[None, :, :]).reshape(C * HW, F1)
    b1_fused = b1.astype(jnp.float32) + bc[0] * jnp.sum(w1, axis=1)
    return (
        w_fused.astype(jnp.bfloat16),                # (K, F1)  bf16 MXU operand
        b1_fused.reshape(1, F1).astype(jnp.float32), # (1, F1)
        w2.reshape(1, F1).astype(jnp.float32),       # (1, F1)
        b2.astype(jnp.float32),                      # (1,)
    )


@jax.jit
def value_head_pallas(x, w_fused, b1_fused, w2_row, b2):
    N, C, H, W = x.shape
    K = C * H * W
    x_flat = x.reshape(N, K).astype(jnp.float32)     # pure reshape, no data movement

    vmem = pl.BlockSpec(memory_space=pltpu.MemorySpace.VMEM)
    smem = pl.BlockSpec(memory_space=pltpu.MemorySpace.SMEM)

    return pl.pallas_call(
        _value_head_kernel,
        out_shape=jax.ShapeDtypeStruct((N, 1), jnp.float32),
        in_specs=[vmem,          # x
                  vmem, vmem,    # fused weight / fused bias
                  vmem,          # fc2 weight row
                  smem],         # fc2 bias scalar
        out_specs=vmem,
    )(x_flat, w_fused, b1_fused, w2_row, b2)


# ----------------------- plain-JAX reference (for checking) -----------------------
def value_head_ref(x, wc, bc, w1, b1, w2, b2):
    N, C, H, W = x.shape
    y = jax.lax.conv_general_dilated(
        x, wc, window_strides=(1, 1), padding="VALID",
        dimension_numbers=("NCHW", "OIHW", "NCHW"))
    y = y + bc[None, :, None, None]
    y = y.reshape(N, H * W)
    h = jax.nn.relu(y @ w1.T + b1)
    return jnp.tanh(h @ w2.T + b2)


if __name__ == "__main__":
    # The module's x.view(-1, 8*8) requires an 8x8 spatial grid.
    N, C, H, W = 2, 4, 8, 8
    F1 = 256

    key = jax.random.PRNGKey(0)
    keys = jax.random.split(key, 7)
    x = jax.random.normal(keys[0], (N, C, H, W), jnp.float32)

    # deterministic synthetic parameters (shapes from nn.Conv2d / nn.Linear)
    wc = jax.random.normal(keys[1], (1, C, 1, 1), jnp.float32) * 0.3
    bc = jax.random.normal(keys[2], (1,), jnp.float32) * 0.1
    w1 = jax.random.normal(keys[3], (F1, H * W), jnp.float32) * 0.1
    b1 = jax.random.normal(keys[4], (F1,), jnp.float32) * 0.1
    w2 = jax.random.normal(keys[5], (1, F1), jnp.float32) * 0.1
    b2 = jax.random.normal(keys[6], (1,), jnp.float32) * 0.1

    # One-time weight fold/pack (outside the per-call path).
    packed = prepare_value_head_params(wc, bc, w1, b1, w2, b2)
    packed = jax.block_until_ready(packed)

    out = value_head_pallas(x, *packed)
    out = jax.block_until_ready(out)

    ref = value_head_ref(x, wc, bc, w1, b1, w2, b2)
    assert out.shape == (N, 1) and out.dtype == jnp.float32
    # bf16 MXU operands (f32 accumulation) -> loosened tolerance vs. pure f32.
    err = float(jnp.max(jnp.abs(out - ref)))
    assert jnp.allclose(out, ref, atol=1e-2, rtol=1e-2), err

    print("KERNEL_OK")
</pallas_src>

<mosaic_0001>
module attributes {stable_mosaic.version = 11 : i64} {
  func.func @_value_head_kernel(%arg0: memref<2x256xf32, #tpu.memory_space<vmem>>, %arg1: memref<256x256xbf16, #tpu.memory_space<vmem>>, %arg2: memref<1x256xf32, #tpu.memory_space<vmem>>, %arg3: memref<1x256xf32, #tpu.memory_space<vmem>>, %arg4: memref<1xf32, #tpu.memory_space<smem>>, %arg5: memref<2x1xf32, #tpu.memory_space<vmem>>) attributes {dimension_semantics = [], scalar_prefetch = 0 : i64, scratch_operands = 0 : i64, tpu.core_type = #tpu.core_type<tc>} {
    %c0 = arith.constant 0 : index
    %c0_0 = arith.constant 0 : index
    %0 = vector.load %arg0[%c0, %c0_0] : memref<2x256xf32, #tpu.memory_space<vmem>>, vector<2x256xf32>
    %1 = arith.truncf %0 : vector<2x256xf32> to vector<2x256xbf16>
    %c0_1 = arith.constant 0 : index
    %c0_2 = arith.constant 0 : index
    %2 = vector.load %arg1[%c0_1, %c0_2] : memref<256x256xbf16, #tpu.memory_space<vmem>>, vector<256x256xbf16>
    %cst = arith.constant dense<0.000000e+00> : vector<2x256xf32>
    %3 = tpu.matmul %1, %2, %cst {dimension_numbers = #tpu.dot_dimension_numbers<[1], [0], [0], [1], [0, 0, 1, 1], [], []>} : vector<2x256xbf16>, vector<256x256xbf16>, vector<2x256xf32> -> vector<2x256xf32>
    %c0_3 = arith.constant 0 : index
    %c0_4 = arith.constant 0 : index
    %4 = vector.load %arg2[%c0_3, %c0_4] : memref<1x256xf32, #tpu.memory_space<vmem>>, vector<1x256xf32>
    %5 = vector.broadcast %4 : vector<1x256xf32> to vector<2x256xf32>
    %6 = arith.addf %3, %5 : vector<2x256xf32>
    %cst_5 = arith.constant 0.000000e+00 : f32
    %7 = vector.broadcast %cst_5 : f32 to vector<2x256xf32>
    %8 = arith.maximumf %6, %7 : vector<2x256xf32>
    %c0_6 = arith.constant 0 : index
    %c0_7 = arith.constant 0 : index
    %9 = vector.load %arg3[%c0_6, %c0_7] : memref<1x256xf32, #tpu.memory_space<vmem>>, vector<1x256xf32>
    %10 = vector.broadcast %9 : vector<1x256xf32> to vector<2x256xf32>
    %11 = arith.mulf %8, %10 : vector<2x256xf32>
    %cst_8 = arith.constant dense<0.000000e+00> : vector<2xf32>
    %12 = vector.multi_reduction <add>, %11, %cst_8 [1] : vector<2x256xf32> to vector<2xf32>
    %13 = vector.shape_cast %12 : vector<2xf32> to vector<2x1xf32>
    %c0_9 = arith.constant 0 : index
    %14 = memref.load %arg4[%c0_9] : memref<1xf32, #tpu.memory_space<smem>>
    %15 = vector.broadcast %14 : f32 to vector<2x1xf32>
    %16 = arith.addf %13, %15 : vector<2x1xf32>
    %17 = math.tanh %16 : vector<2x1xf32>
    %c0_10 = arith.constant 0 : index
    %c0_11 = arith.constant 0 : index
    %18 = vector.load %arg5[%c0_10, %c0_11] : memref<2x1xf32, #tpu.memory_space<vmem>>, vector<2x1xf32>
    tpu.vector_store %arg5[%c0_10, %c0_11], %17 {strides = array<i32>} : memref<2x1xf32, #tpu.memory_space<vmem>>, vector<2x1xf32>,
    return
  }
}

</mosaic_0001>

<bundles_post_ra>
// kernel: value_head_pallas.1
= control target key start
LH: loop header
LB: loop body
LE: loop exit
PB: predicated region body
PF: predicated region fallthrough
CT: control target
= control target key end

     0   :  { %11 = vsyncpa [#allocation4], 0  ;;  %s437_s18 = smov [#allocation3]   ;;  %s497_s0 = inlined_call_operand.vmem [shape: f32[2,256], index: 0, kind: input, shape index: {}]   ;;  %s498_s1 = inlined_call_operand.hbm [shape: bf16[256,256], index: 1, kind: input, shape index: {}]   ;;  %s499_s2 = inlined_call_operand.vmem [shape: f32[1,256], index: 2, kind: input, shape index: {}]   ;;  %s500_s3 = inlined_call_operand.vmem [shape: f32[1,256], index: 3, kind: input, shape index: {}]   ;;  %s501_s4 = inlined_call_operand.<no memory space> [shape: f32[1], index: 4, kind: input, shape index: {}]   ;;  %s502_s5 = inlined_call_operand.vmem [shape: f32[2,1], index: 5, kind: output, shape index: {}]  }
   0x1   :  { %s19_s19 = sshll.u32 %s437_s18, 4  ;;  %s413_s22 = scalar_lea.hbm %s498_s1, 4096  ;;  %s20_s19 = int_to_ptr.vmem [resolvable:$true] %s19_s19 }
   0x2   :  { %p414_p0 = scmp.ne.s32.totalorder %s498_s1, %s413_s22  ;;  %p417_p1 = scmp.lt.u32.totalorder %s413_s22, %s498_s1 }
   0x4   :  { %p419_p2 = pnand %p417_p1, %p414_p0 }
   0x6   :  { %422 = shalt.err (!%p419_p2)
}
   0x7   :  { %s423_s27 = scalar_lea.vmem %s20_s19, 4096  ;;  %p428_p4 = scmp.lt.s32.totalorder %s20_s19, %s20_s19 }
   0x8   :  { %p424_p3 = scmp.ne.s32.totalorder %s20_s19, %s423_s27  ;;  %p429_p5 = scmp.lt.s32.totalorder %s423_s27, %s423_s27 }
   0xa   :  { %p430_p6 = por %p429_p5, %p428_p4 }
   0xc   :  { %p431_p7 = pnand %p430_p6, %p424_p3 }
   0xe   :  { %434 = shalt.err (!%p431_p7)
}
   0xf   :  { %s438_s28 = smov 128   ;;  %s439_s29 = smov 8  }
  0x10   :  { %25 = dma.hbm_to_vmem [thread:$0]  %s498_s1, 4096, %s20_s19, [#allocation4], %s438_s28, %s438_s28, %s439_s29  }
  0x11   :  { %435 = dma.done.wait [#allocation4], 4096  }
  0x12   :  { %436 = vsyncadd [#allocation4], 4294963200  ;;  %v363_v0 = vld [vmem:[#allocation3 + $0x4] ss:$8 sps:$4 sm:$0xff]   ;;  %v365_v1 = vld [vmem:[#allocation3] ss:$8 sps:$4 sm:$0xff]   ;;  %v83_v36 = vlaneseq  ;;  %v317_v59 = vstv %s501_s4 }
  0x13   :  { %253 = vmatprep.subr.bf16.mxu0 %v363_v0  ;;  %v366_v2 = vld [vmem:[#allocation3 + $0x14] ss:$8 sps:$4 sm:$0xff]   ;;  %v368_v3 = vld [vmem:[#allocation3 + $0x10] ss:$8 sps:$4 sm:$0xff]   ;;  %v369_v4 = vld [vmem:[#allocation3 + $0x24] ss:$8 sps:$4 sm:$0xff]  }
  0x14   :  { %254 = vmatpush1.bf16.msra.mxu0 %v365_v1  ;;  %v371_v5 = vld [vmem:[#allocation3 + $0x20] ss:$8 sps:$4 sm:$0xff]   ;;  %v372_v6 = vld [vmem:[#allocation3 + $0x34] ss:$8 sps:$4 sm:$0xff]   ;;  %v374_v7 = vld [vmem:[#allocation3 + $0x30] ss:$8 sps:$4 sm:$0xff]  }
  0x15   :  { %255 = vmatprep.subr.bf16.mxu0 %v366_v2  ;;  %v375_v8 = vld [vmem:[#allocation3 + $0x44] ss:$8 sps:$4 sm:$0xff]   ;;  %v377_v9 = vld [vmem:[#allocation3 + $0x40] ss:$8 sps:$4 sm:$0xff]   ;;  %v378_v10 = vld [vmem:[#allocation3 + $0x54] ss:$8 sps:$4 sm:$0xff]  }
  0x16   :  { %v380_v11 = vld [vmem:[#allocation3 + $0x50] ss:$8 sps:$4 sm:$0xff]   ;;  %v381_v12 = vld [vmem:[#allocation3 + $0x64] ss:$8 sps:$4 sm:$0xff]   ;;  %v383_v15 = vld [vmem:[#allocation3 + $0x60] ss:$8 sps:$4 sm:$0xff]  }
  0x17   :  { %v327_v13 = vld.sshfl [vmem:[%s497_s0] sm:$0x33 pattern:$0x76325410]  ;;  %v384_v16 = vld [vmem:[#allocation3 + $0x74] ss:$8 sps:$4 sm:$0xff]  }
  0x18   :  { %256 = vmatpush1.bf16.msra.mxu0 %v368_v3  ;;  %v44_v14 = vcombine.high %v327_v13, %v327_v13  ;;  %v386_v18 = vld [vmem:[#allocation3 + $0x70] ss:$8 sps:$4 sm:$0xff]   ;;  %v387_v19 = vld [vmem:[#allocation3 + $0x84] ss:$8 sps:$4 sm:$0xff]   ;;  %v389_v20 = vld [vmem:[#allocation3 + $0x80] ss:$8 sps:$4 sm:$0xff]   ;;  %v47_v35 = vpack.c.bf16 %v327_v13, %v327_v13 }
  0x19   :  { %257 = vmatprep.subr.bf16.mxu0 %v369_v4  ;;  %v390_v21 = vld [vmem:[#allocation3 + $0x94] ss:$8 sps:$4 sm:$0xff]   ;;  %v392_v22 = vld [vmem:[#allocation3 + $0x90] ss:$8 sps:$4 sm:$0xff]   ;;  %v393_v23 = vld [vmem:[#allocation3 + $0xa4] ss:$8 sps:$4 sm:$0xff]  }
  0x1a   :  { %v48_v17 = vpack.c.bf16 %v44_v14, %v44_v14  ;;  %v395_v24 = vld [vmem:[#allocation3 + $0xa0] ss:$8 sps:$4 sm:$0xff]   ;;  %v396_v25 = vld [vmem:[#allocation3 + $0xb4] ss:$8 sps:$4 sm:$0xff]   ;;  %v398_v26 = vld [vmem:[#allocation3 + $0xb0] ss:$8 sps:$4 sm:$0xff]  }
  0x1b   :  { %v399_v27 = vld [vmem:[#allocation3 + $0xc4] ss:$8 sps:$4 sm:$0xff]   ;;  %v401_v28 = vld [vmem:[#allocation3 + $0xc0] ss:$8 sps:$4 sm:$0xff]   ;;  %v402_v29 = vld [vmem:[#allocation3 + $0xd4] ss:$8 sps:$4 sm:$0xff]  }
  0x1c   :  { %258 = vmatpush1.bf16.msra.mxu0 %v371_v5  ;;  %285 = vmatprep.mubr.bf16.mxu0 %v48_v17  ;;  %v404_v30 = vld [vmem:[#allocation3 + $0xd0] ss:$8 sps:$4 sm:$0xff]   ;;  %v405_v31 = vld [vmem:[#allocation3 + $0xe4] ss:$8 sps:$4 sm:$0xff]   ;;  %v407_v32 = vld [vmem:[#allocation3 + $0xe0] ss:$8 sps:$4 sm:$0xff]  }
  0x1d   :  { %259 = vmatprep.subr.bf16.mxu0 %v372_v6  ;;  %v408_v33 = vld [vmem:[#allocation3 + $0xf4] ss:$8 sps:$4 sm:$0xff]   ;;  %v410_v34 = vld [vmem:[#allocation3 + $0xf0] ss:$8 sps:$4 sm:$0xff]   ;;  %v84_v37 = vshrl.u32 %v83_v36, 7  ;;  %vm310_vm0 = vcmask 1041408  }
  0x1e   :  { %v81_v39 = vld [vmem:[%s499_s2] sm:$0x3]  ;;  %vm320_vm1 = vcmask 1024  }
  0x1f   :  { %v85_v38 = vsub.s32 0, %v84_v37  ;;  %v89_v40 = vsub.s32 1, %v84_v37  ;;  %v296_v43 = vld [vmem:[%s500_s3] sm:$0x3] }
  0x20   :  { %260 = vmatpush1.bf16.msra.mxu0 %v374_v7 }
  0x21   :  { %261 = vmatprep.subr.bf16.mxu0 %v375_v8  ;;  %v86_v41 = vrot.slane %v81_v39, %v85_v38  ;;  %v90_v42 = vrot.slane %v81_v39, %v89_v40  ;;  %v301_v47 = vrot.slane %v296_v43, %v85_v38  ;;  %v305_v50 = vrot.slane %v296_v43, %v89_v40 }
  0x24   :  { %262 = vmatpush1.bf16.msra.mxu0 %v377_v9 }
  0x25   :  { %263 = vmatprep.subr.bf16.mxu0 %v378_v10 }
  0x28   :  { %264 = vmatpush1.bf16.msra.mxu0 %v380_v11 }
  0x29   :  { %265 = vmatprep.subr.bf16.mxu0 %v381_v12 }
  0x2c   :  { %266 = vmatpush1.bf16.msra.mxu0 %v383_v15 }
  0x2d   :  { %267 = vmatprep.subr.bf16.mxu0 %v384_v16 }
  0x30   :  { %268 = vmatpush1.bf16.msra.mxu0 %v386_v18 }
  0x31   :  { %269 = vmatprep.subr.bf16.mxu0 %v387_v19 }
  0x34   :  { %270 = vmatpush1.bf16.msra.mxu0 %v389_v20 }
  0x35   :  { %271 = vmatprep.subr.bf16.mxu0 %v390_v21 }
  0x38   :  { %272 = vmatpush1.bf16.msra.mxu0 %v392_v22 }
  0x39   :  { %273 = vmatprep.subr.bf16.mxu0 %v393_v23 }
  0x3c   :  { %274 = vmatpush1.bf16.msra.mxu0 %v395_v24 }
  0x3d   :  { %275 = vmatprep.subr.bf16.mxu0 %v396_v25 }
  0x40   :  { %276 = vmatpush1.bf16.msra.mxu0 %v398_v26 }
  0x41   :  { %277 = vmatprep.subr.bf16.mxu0 %v399_v27 }
  0x44   :  { %278 = vmatpush1.bf16.msra.mxu0 %v401_v28 }
  0x45   :  { %279 = vmatprep.subr.bf16.mxu0 %v402_v29 }
  0x48   :  { %280 = vmatpush1.bf16.msra.mxu0 %v404_v30 }
  0x49   :  { %281 = vmatprep.subr.bf16.mxu0 %v405_v31 }
  0x4c   :  { %282 = vmatpush1.bf16.msra.mxu0 %v407_v32 }
  0x4d   :  { %283 = vmatprep.subr.bf16.mxu0 %v408_v33 }
  0x50   :  { %284 = vmatpush1.bf16.msra.mxu0 %v410_v34 }
  0x53   :  { %286 = vmatmul.mubr.bf16.vlgmr.msra.gmra.mrb[0].mxu0 %v47_v35 }
 0x126   :  { %v287_v44 = vpop.f32.mrb[0].mxu0 }
 0x127   :  { %v288_v45 = vadd.f32 %v287_v44, %v86_v41  ;;  %v289_v46 = vpop.f32.mrb[1].mxu0 }
 0x128   :  { %v290_v48 = vadd.f32 %v289_v46, %v90_v42  ;;  %v291_v49 = vpop.f32.mrb[2].mxu0 }
 0x129   :  { %v294_v51 = vmax.f32 %v288_v45, 0.0  ;;  %v292_v52 = vpop.f32.mrb[3].mxu0 }
 0x12a   :  { %v295_v53 = vmax.f32 %v290_v48, 0.0 }
 0x12b   :  { %v308_v54 = vmul.f32 %v301_v47, %v294_v51 }
 0x12c   :  { %v309_v55 = vmul.f32 %v305_v50, %v295_v53 }
 0x12d   :  { %v311_v56 = vsel %vm310_vm0, %v308_v54, 0.0 }
 0x12e   :  { %v312_v57 = vsel %vm310_vm0, %v309_v55, 0.0 }
 0x12f   :  { %v313_v58 = vadd.f32 %v312_v57, %v311_v56 }
 0x131   :  { %314 = vadd.xlane.f32.xlu0 %v313_v58 }
 0x1be   :  { %v315_v60 = vpop.xlane.xlu0 %314 }
 0x1bf   :  { %v318_v61 = vadd.f32 %v317_v59, %v315_v60 }
 0x1c1   :  { %411 = vtanh.f32 %v318_v61 }
 0x1cb   :  { %v412_v62 = vpop.eup %411 }
 0x1cc   :  { %321 = vst.msk [vmem:[%s502_s5] sm:$0x3] %vm320_vm1, %v412_v62 }
 0x1cd   :  { %326 = vsyncpa [#allocation4], 1 }

</bundles_post_ra>
